<compile_context>
chip_gen: v5e
topology: v5e:2x2
jax: 0.10.0
libtpu: 0.0.40
codegen_flags: <defaults>
</compile_context>

<pallas_src>
import jax
import jax.numpy as jnp
from jax.experimental import pallas as pl
from jax.experimental.pallas import tpu as pltpu


# ----------------------------------------------------------------------------
# Kernel: fused linear + bias + ReLU with K-tiled accumulation.
# ----------------------------------------------------------------------------
def _linear_relu_kernel(x_ref, wt_ref, b_ref, o_ref, acc_ref):
    # grid = (N, M, K); K is the innermost (reduction) axis.
    # x_ref  : (TM, TK)  bf16 activation tile
    # wt_ref : (TK, TN)  bf16 pre-transposed weight tile (= W.T slice)
    # b_ref  : (1,  TN)  f32 bias row (implicit row broadcast)
    # o_ref  : (TM, TN)  output tile
    # acc_ref: (TM, TN)  f32 accumulator scratch
    k = pl.program_id(2)

    @pl.when(k == 0)
    def _():
        acc_ref[...] = jnp.zeros_like(acc_ref)

    acc_ref[...] += jnp.dot(x_ref[...], wt_ref[...],
                            preferred_element_type=jnp.float32)

    @pl.when(k == pl.num_programs(2) - 1)
    def _():
        y = acc_ref[...] + b_ref[...]          # f32, lane-dense row broadcast
        o_ref[...] = jnp.maximum(y, 0.0).astype(o_ref.dtype)


# ----------------------------------------------------------------------------
# Helpers
# ----------------------------------------------------------------------------
def _round_up(v, m):
    return ((v + m - 1) // m) * m


def _pick_tile(dim, max_tile, align):
    """Largest `align`-multiple <= max_tile that divides `dim` (dim % align == 0)."""
    if dim <= max_tile:
        return dim
    t = (max_tile // align) * align
    while t > align and dim % t != 0:
        t -= align
    return t


# ----------------------------------------------------------------------------
# One-time parameter prep ("model init") — hoisted out of the per-call path.
# ----------------------------------------------------------------------------
def prepare_params(w, b, *, param_dtype=jnp.bfloat16):
    """Transpose W once, cast to bf16, pad both dims to lane multiples."""
    f_out, f_in = w.shape
    fk = _round_up(f_in, 128)      # contraction dim (padded)
    fn = _round_up(f_out, 128)     # output-feature dim (padded)
    wt = jnp.pad(w.T.astype(param_dtype), ((0, fk - f_in), (0, fn - f_out)))
    b_row = jnp.pad(b.astype(jnp.float32), (0, fn - f_out)).reshape(1, fn)
    return {"wt": wt, "b": b_row, "f_in": f_in, "f_out": f_out}


# ----------------------------------------------------------------------------
# Forward pass
# ----------------------------------------------------------------------------
def my_model_forward(x, params, *, out_dtype=None,
                     tm_max=256, tn_max=512, tk_max=2048,
                     vmem_limit_bytes=48 * 1024 * 1024):
    """relu(x @ W.T + b) with pre-prepared params (see prepare_params)."""
    wt, b_row = params["wt"], params["b"]
    f_in, f_out = params["f_in"], params["f_out"]
    B, F = x.shape
    assert F == f_in, "input feature dim must match the Linear in_features"
    fk, fn = wt.shape
    out_dtype = out_dtype or x.dtype

    # --- batch (M) tiling: multiple of 16 (bf16 packing); prefer tm | B ----
    tm = min(tm_max, _round_up(B, 16))
    if B > tm_max and B % tm_max != 0:
        t = tm_max
        while t > 16 and B % t != 0:
            t -= 16
        if B % t == 0:
            tm = t
    grid_m = pl.cdiv(B, tm)
    b_pad = grid_m * tm

    # --- N / K tiling (fn, fk are 128-multiples after prepare_params) ------
    tn = _pick_tile(fn, tn_max, 128)
    tk = _pick_tile(fk, tk_max, 128)
    grid_n = fn // tn
    grid_k = fk // tk

    # --- activation prep (bf16 MXU operands, f32 accumulation) -------------
    x_bf = x.astype(jnp.bfloat16)
    if b_pad != B or fk != F:
        x_bf = jnp.pad(x_bf, ((0, b_pad - B), (0, fk - F)))

    cost = pl.CostEstimate(
        flops=2 * B * f_in * f_out,
        transcendentals=0,
        bytes_accessed=(B * F * 2 + fk * fn * 2 + fn * 4
                        + B * f_out * jnp.dtype(out_dtype).itemsize),
    )

    out = pl.pallas_call(
        _linear_relu_kernel,
        out_shape=jax.ShapeDtypeStruct((b_pad, fn), out_dtype),
        grid_spec=pltpu.PrefetchScalarGridSpec(
            num_scalar_prefetch=0,
            grid=(grid_n, grid_m, grid_k),      # N leads (core split), K innermost
            in_specs=[
                pl.BlockSpec((tm, tk), lambda j, i, k: (i, k)),   # x tile
                pl.BlockSpec((tk, tn), lambda j, i, k: (k, j)),   # W.T tile
                pl.BlockSpec((1, tn), lambda j, i, k: (0, j)),    # bias row
            ],
            out_specs=pl.BlockSpec((tm, tn), lambda j, i, k: (i, j)),
            scratch_shapes=[pltpu.VMEM((tm, tn), jnp.float32)],
        ),
        compiler_params=pltpu.CompilerParams(
            dimension_semantics=("parallel", "parallel", "arbitrary"),
            vmem_limit_bytes=vmem_limit_bytes,
        ),
        cost_estimate=cost,
    )(x_bf, wt, b_row)
    # NOTE: if profiling ever shows exposed weight DMA, add
    # pipeline_mode=pl.Buffered(3) on the W.T BlockSpec only (check VMEM headroom).

    if b_pad != B or fn != f_out:
        out = out[:B, :f_out]
    return out


def _reference(x, w, b):
    return jnp.maximum(x @ w.T + b, 0.0)


if __name__ == "__main__":
    feat_dim = 128   # lane-aligned feature dimension
    batch = 16

    key = jax.random.PRNGKey(0)
    kx, kw, kb = jax.random.split(key, 3)

    x = jax.random.normal(kx, (batch, feat_dim), dtype=jnp.float32)
    # Deterministic synthetic parameters (no checkpoint loading).
    w = jax.random.normal(kw, (feat_dim, feat_dim), dtype=jnp.float32) * 0.02
    b = jax.random.normal(kb, (feat_dim,), dtype=jnp.float32) * 0.02

    # "Model init": one-time weight transpose / cast / pad.
    params = prepare_params(w, b)

    out = my_model_forward(x, params)
    out = jax.block_until_ready(out)

    ref = _reference(x, w, b)
    assert out.shape == (batch, feat_dim)
    # bf16 MXU operands with f32 accumulation -> loosened tolerance.
    assert jnp.allclose(out, ref, atol=2e-2, rtol=2e-2)

    print("KERNEL_OK")
</pallas_src>

<mosaic_0001>
module attributes {stable_mosaic.version = 11 : i64} {
  func.func @_linear_relu_kernel(%arg0: i32, %arg1: i32, %arg2: i32, %arg3: memref<16x128xbf16, #tpu.memory_space<vmem>>, %arg4: memref<128x128xbf16, #tpu.memory_space<vmem>>, %arg5: memref<1x128xf32, #tpu.memory_space<vmem>>, %arg6: memref<16x128xf32, #tpu.memory_space<vmem>>, %arg7: memref<16x128xf32, #tpu.memory_space<vmem>>) attributes {dimension_semantics = [#tpu.dimension_semantics<parallel>, #tpu.dimension_semantics<parallel>, #tpu.dimension_semantics<arbitrary>], iteration_bounds = array<i64: 1, 1, 1>, scalar_prefetch = 0 : i64, scratch_operands = 1 : i64, tpu.core_type = #tpu.core_type<tc>, window_params = [{transform_indices = @transform_0, window_bounds = array<i64: 16, 128>}, {transform_indices = @transform_1, window_bounds = array<i64: 128, 128>}, {transform_indices = @transform_2, window_bounds = array<i64: 1, 128>}, {transform_indices = @transform_3, window_bounds = array<i64: 16, 128>}]} {
    %c0_i32 = arith.constant 0 : i32
    %0 = arith.cmpi eq, %arg2, %c0_i32 : i32
    %1 = arith.extui %0 : i1 to i32
    %c0_i32_0 = arith.constant 0 : i32
    %2 = arith.cmpi ne, %1, %c0_i32_0 : i32
    scf.if %2 {
      %cst_10 = arith.constant 0.000000e+00 : f32
      %12 = vector.broadcast %cst_10 : f32 to vector<16x128xf32>
      %c0_11 = arith.constant 0 : index
      %c0_12 = arith.constant 0 : index
      %13 = vector.load %arg7[%c0_11, %c0_12] : memref<16x128xf32, #tpu.memory_space<vmem>>, vector<16x128xf32>
      tpu.vector_store %arg7[%c0_11, %c0_12], %12 {strides = array<i32>} : memref<16x128xf32, #tpu.memory_space<vmem>>, vector<16x128xf32>,
    } else {
    }
    %c0 = arith.constant 0 : index
    %c0_1 = arith.constant 0 : index
    %3 = vector.load %arg7[%c0, %c0_1] : memref<16x128xf32, #tpu.memory_space<vmem>>, vector<16x128xf32>
    %c0_2 = arith.constant 0 : index
    %c0_3 = arith.constant 0 : index
    %4 = vector.load %arg3[%c0_2, %c0_3] : memref<16x128xbf16, #tpu.memory_space<vmem>>, vector<16x128xbf16>
    %c0_4 = arith.constant 0 : index
    %c0_5 = arith.constant 0 : index
    %5 = vector.load %arg4[%c0_4, %c0_5] : memref<128x128xbf16, #tpu.memory_space<vmem>>, vector<128x128xbf16>
    %cst = arith.constant dense<0.000000e+00> : vector<16x128xf32>
    %6 = tpu.matmul %4, %5, %cst {dimension_numbers = #tpu.dot_dimension_numbers<[1], [0], [0], [1], [0, 0, 1, 1], [], []>} : vector<16x128xbf16>, vector<128x128xbf16>, vector<16x128xf32> -> vector<16x128xf32>
    %7 = arith.addf %3, %6 : vector<16x128xf32>
    %c0_6 = arith.constant 0 : index
    %c0_7 = arith.constant 0 : index
    %8 = vector.load %arg7[%c0_6, %c0_7] : memref<16x128xf32, #tpu.memory_space<vmem>>, vector<16x128xf32>
    tpu.vector_store %arg7[%c0_6, %c0_7], %7 {strides = array<i32>} : memref<16x128xf32, #tpu.memory_space<vmem>>, vector<16x128xf32>,
    %c0_i32_8 = arith.constant 0 : i32
    %9 = arith.cmpi eq, %arg2, %c0_i32_8 : i32
    %10 = arith.extui %9 : i1 to i32
    %c0_i32_9 = arith.constant 0 : i32
    %11 = arith.cmpi ne, %10, %c0_i32_9 : i32
    scf.if %11 {
      %c0_10 = arith.constant 0 : index
      %c0_11 = arith.constant 0 : index
      %12 = vector.load %arg7[%c0_10, %c0_11] : memref<16x128xf32, #tpu.memory_space<vmem>>, vector<16x128xf32>
      %c0_12 = arith.constant 0 : index
      %c0_13 = arith.constant 0 : index
      %13 = vector.load %arg5[%c0_12, %c0_13] : memref<1x128xf32, #tpu.memory_space<vmem>>, vector<1x128xf32>
      %14 = vector.broadcast %13 : vector<1x128xf32> to vector<16x128xf32>
      %15 = arith.addf %12, %14 : vector<16x128xf32>
      %cst_14 = arith.constant 0.000000e+00 : f32
      %16 = vector.broadcast %cst_14 : f32 to vector<16x128xf32>
      %17 = arith.maximumf %15, %16 : vector<16x128xf32>
      %c0_15 = arith.constant 0 : index
      %c0_16 = arith.constant 0 : index
      %18 = vector.load %arg6[%c0_15, %c0_16] : memref<16x128xf32, #tpu.memory_space<vmem>>, vector<16x128xf32>
      tpu.vector_store %arg6[%c0_15, %c0_16], %17 {strides = array<i32>} : memref<16x128xf32, #tpu.memory_space<vmem>>, vector<16x128xf32>,
    } else {
    }
    return
  }
  func.func @transform_0(%arg0: i32, %arg1: i32, %arg2: i32) -> (i32, i32) {
    %c0_i32 = arith.constant 0 : i32
    return %arg1, %arg2 : i32, i32
  }
  func.func @transform_1(%arg0: i32, %arg1: i32, %arg2: i32) -> (i32, i32) {
    %c0_i32 = arith.constant 0 : i32
    return %arg2, %arg0 : i32, i32
  }
  func.func @transform_2(%arg0: i32, %arg1: i32, %arg2: i32) -> (i32, i32) {
    %c0_i32 = arith.constant 0 : i32
    %c0_i32_0 = arith.constant 0 : i32
    return %c0_i32, %arg0 : i32, i32
  }
  func.func @transform_3(%arg0: i32, %arg1: i32, %arg2: i32) -> (i32, i32) {
    %c0_i32 = arith.constant 0 : i32
    return %arg1, %arg0 : i32, i32
  }
}

</mosaic_0001>

<bundles_post_ra>
// kernel: tpu_custom_call.1
= control target key start
LH: loop header
LB: loop body
LE: loop exit
PB: predicated region body
PF: predicated region fallthrough
CT: control target
= control target key end

     0   :  { %8 = vsyncpa [#allocation4], 0  ;;  %s350_s0 = inlined_call_operand.hbm [shape: bf16[16,128], index: 0, kind: input, shape index: {}]   ;;  %s351_s1 = inlined_call_operand.hbm [shape: bf16[128,128], index: 1, kind: input, shape index: {}]   ;;  %s352_s2 = inlined_call_operand.vmem [shape: f32[1,128], index: 2, kind: input, shape index: {}]   ;;  %s353_s3 = inlined_call_operand.hbm [shape: f32[16,128], index: 3, kind: output, shape index: {}]  }
   0x1   :  { %9 = vsyncpa [#allocation7], 0 }
   0x2   :  { %10 = vsyncpa [#allocation5], 0  ;;  %s15_s14 = sshll.u32 %s350_s0, 4  ;;  %s311_s15 = smov [#allocation3]   ;;  %s16_s14 = int_to_ptr.hbm [resolvable:$true] %s15_s14 }
   0x3   :  { %s17_s16 = sshll.u32 %s311_s15, 4  ;;  %s28_s19 = sshll.u32 %s351_s1, 4  ;;  %s18_s16 = int_to_ptr.vmem [resolvable:$true] %s17_s16  ;;  %s29_s19 = int_to_ptr.hbm [resolvable:$true] %s28_s19 }
   0x4   :  { %s312_s20 = smov 64   ;;  %s313_s21 = smov 4  }
   0x5   :  { %23 = dma.hbm_to_vmem [thread:$0]  %s16_s14, 128, %s18_s16, [#allocation4], %s312_s20, %s312_s20, %s313_s21  }
   0x6   :  { %s314_s22 = smov [#allocation6]  }
   0x7   :  { %s30_s23 = sshll.u32 %s314_s22, 4  ;;  %s31_s23 = int_to_ptr.vmem [resolvable:$true] %s30_s23 }
   0x8   :  { %36 = dma.hbm_to_vmem [thread:$0]  %s29_s19, 1024, %s31_s23, [#allocation7], %s312_s20, %s312_s20, %s313_s21  }
   0x9   :  { %305 = dma.done.wait [#allocation4], 128  }
   0xa   :  { %306 = vsyncadd [#allocation4], 4294967168 }
   0xb   :  { %307 = dma.done.wait [#allocation7], 1024  }
   0xc   :  { %308 = vsyncadd [#allocation7], 4294966272  ;;  %v224_v0 = vld [vmem:[#allocation6 + $0x38] sm:$0xff]  ;;  %v223_v1 = vld [vmem:[#allocation6 + $0x30] sm:$0xff]  ;;  %s315_s24 = smov [#allocation8]   ;;  %s166_s28 = sshll.u32 %s353_s3, 4  ;;  %s167_s28 = int_to_ptr.hbm [resolvable:$true] %s166_s28 }
   0xd   :  { %127 = vmatpush.bf16.msra.mxu0 %v224_v0  ;;  %v222_v2 = vld [vmem:[#allocation6 + $0x28] sm:$0xff]  ;;  %v221_v3 = vld [vmem:[#allocation6 + $0x20] sm:$0xff]  ;;  %v220_v4 = vld [vmem:[#allocation6 + $0x18] sm:$0xff]  ;;  %s164_s25 = sshll.u32 %s315_s24, 4  ;;  %s316_s29 = smov 128   ;;  %s165_s25 = int_to_ptr.vmem [resolvable:$true] %s164_s25 }
   0xe   :  { %v219_v5 = vld [vmem:[#allocation6 + $0x10] sm:$0xff]  ;;  %v218_v6 = vld [vmem:[#allocation6 + $0x8] sm:$0xff]  ;;  %v217_v7 = vld [vmem:[#allocation6] sm:$0xff]  ;;  %s317_s30 = smov 8  }
   0xf   :  { %v216_v8 = vld [vmem:[#allocation3] sm:$0xff] }
  0x10   :  { %v232_v9 = vld [vmem:[%s352_s2] ss:$0 sm:$0xff] }
  0x11   :  { %128 = vmatpush.bf16.msra.mxu0 %v223_v1 }
  0x15   :  { %129 = vmatpush.bf16.msra.mxu0 %v222_v2 }
  0x19   :  { %130 = vmatpush.bf16.msra.mxu0 %v221_v3 }
  0x1d   :  { %131 = vmatpush.bf16.msra.mxu0 %v220_v4 }
  0x21   :  { %132 = vmatpush.bf16.msra.mxu0 %v219_v5 }
  0x25   :  { %133 = vmatpush.bf16.msra.mxu0 %v218_v6 }
  0x29   :  { %134 = vmatpush.bf16.msra.mxu0 %v217_v7 }
  0x2c   :  { %135 = vmatmul.bf16.vlgmr.msra.gmra.mxu0 %v216_v8 }
  0xa9   :  { %v136_v10 = vpop.f32.mrf.mxu0 }
  0xaa   :  { %v154_v11 = vadd.f32 %v232_v9, %v136_v10 }
  0xac   :  { %v156_v12 = vmax.f32 %v154_v11, 0.0 }
  0xae   :  { %158 = vst [vmem:[#allocation8] sm:$0xff] %v156_v12 }
  0xb1   :  { %v138_v13 = vpop.f32.mrf.mxu0 }
  0xb2   :  { %v155_v14 = vadd.f32 %v232_v9, %v138_v13 }
  0xb4   :  { %v157_v15 = vmax.f32 %v155_v14, 0.0 }
  0xb6   :  { %159 = vst [vmem:[#allocation8 + $0x8] sm:$0xff] %v157_v15 }
  0xb7   :  { %172 = dma.vmem_to_hbm [thread:$0]  %s165_s25, 256, %s167_s28, [#allocation5], %s316_s29, %s316_s29, %s317_s30  }
  0xb8   :  { %309 = dma.done.wait [#allocation5], 256  }
  0xb9   :  { %310 = vsyncadd [#allocation5], 4294967040 }
  0xba   :  { %177 = vsyncpa [#allocation4], 1 }
  0xbb   :  { %178 = vsyncpa [#allocation7], 1 }
  0xbc   :  { %179 = vsyncpa [#allocation5], 1 }

</bundles_post_ra>
